<compile_context>
chip_gen: v7x
topology: tpu7x:2x2x1
jax: 0.10.0
libtpu: 0.0.40
codegen_flags: <defaults>
</compile_context>

<pallas_src>
import jax
import jax.numpy as jnp
from jax.experimental import pallas as pl
from jax.experimental.pallas import tpu as pltpu


def _round_up(x: int, m: int) -> int:
    return (x + m - 1) // m * m


def _reconstruct_kernel(w_ref, h_ref, o_ref):
    # w_ref: (TM, K_pad)  -- W^T tile, MXU-native LHS
    # h_ref: (K_pad, TN)  -- H tile (resident across the inner M axis)
    # o_ref: (TM, TN)     -- X_hat tile (lane-dense)
    o_ref[...] = jnp.dot(
        w_ref[...], h_ref[...], preferred_element_type=jnp.float32
    ).astype(o_ref.dtype)


def reconstruct_pallas(H, W, *, tm_max=1024, tn_max=2048, out_dtype=jnp.float32):
    """X_hat = W^T @ H via a 2-D tiled Pallas kernel.

    H: (rank, n_features), W: (rank, m_examples) -> (m_examples, n_features).
    out_dtype=jnp.bfloat16 is the fast path (op is HBM-write-bound); the dot
    accumulates in f32 regardless.
    """
    rank_h, n = H.shape
    rank_w, m = W.shape
    assert rank_h == rank_w, "H and W must share the rank (components) axis"
    rank = rank_h

    # K lives in a single block (padded to 8 sublanes only).
    k_pad = _round_up(rank, 8)
    # TODO(synk): no K-tiled / accumulator fallback; guard against huge rank.
    assert k_pad <= 512, "rank too large for single-block K path"

    # Sublane-multiple TM, lane-dense TN.
    tm = min(tm_max, _round_up(m, 8))
    tn = min(tn_max, _round_up(n, 128))
    grid_m = pl.cdiv(m, tm)
    grid_n = pl.cdiv(n, tn)

    # v7x megacore: if the whole problem is one tile, split an axis (when
    # possible) so the two TensorCores both get work.  No-op for v5e/v6e.
    if grid_m * grid_n == 1:
        if n > 128:
            tn = _round_up(pl.cdiv(n, 2), 128)
            grid_n = pl.cdiv(n, tn)
        elif m > 8:
            tm = _round_up(pl.cdiv(m, 2), 8)
            grid_m = pl.cdiv(m, tm)

    # Wrapper-side layout plumbing: MXU-native (M, K) LHS, K zero-padded.
    # (These are tiny: m x k_pad and k_pad x n with k_pad <= 512.)
    if k_pad == rank:
        w_t = W.T
        h_p = H
    else:
        w_t = jnp.zeros((m, k_pad), W.dtype).at[:, :rank].set(W.T)
        h_p = jnp.zeros((k_pad, n), H.dtype).at[:rank, :].set(H)

    out_bytes = jnp.dtype(out_dtype).itemsize
    in_bytes = jnp.dtype(W.dtype).itemsize

    # Double-buffered VMEM footprint + headroom; covers v5e's small scoped
    # default and stays under v7x's 64 MiB physical VMEM.
    vmem_needed = 2 * ((tm * k_pad + k_pad * tn) * in_bytes + tm * tn * out_bytes)
    vmem_limit = min(max(40 << 20, vmem_needed + (8 << 20)), 56 << 20)

    # Grid: N-blocks outer, M-blocks inner -> H block is resident across the
    # inner axis (re-DMA'd only when j changes).
    grid = (grid_n, grid_m)

    out = pl.pallas_call(
        _reconstruct_kernel,
        out_shape=jax.ShapeDtypeStruct((m, n), out_dtype),
        grid_spec=pl.GridSpec(
            grid=grid,
            in_specs=[
                pl.BlockSpec((tm, k_pad), lambda j, i: (i, 0)),
                pl.BlockSpec((k_pad, tn), lambda j, i: (0, j)),
            ],
            out_specs=pl.BlockSpec((tm, tn), lambda j, i: (i, j)),
        ),
        compiler_params=pltpu.CompilerParams(
            dimension_semantics=("parallel", "parallel"),
            vmem_limit_bytes=vmem_limit,
        ),
        cost_estimate=pl.CostEstimate(
            flops=2 * m * n * k_pad,
            transcendentals=0,
            bytes_accessed=(
                grid_n * m * k_pad * in_bytes   # W re-read once per N-block
                + k_pad * n * in_bytes          # H read once (resident inner axis)
                + m * n * out_bytes             # dominant: output writes
            ),
        ),
    )(w_t, h_p)

    return out


class NMFBaseJax:
    """JAX mirror of NMFBase's parameter layout + forward()."""

    def __init__(self, W_shape, H_shape, n_components=5, key=None):
        if key is None:
            key = jax.random.PRNGKey(0)
        self.rank = n_components

        kw, kh = jax.random.split(key)
        # Stored as stacked arrays (avoids a per-forward concat); each row is
        # the analog of one (1, ...) nn.Parameter in the ParameterList.
        self._W = jax.random.uniform(
            kw, (W_shape[0],) + tuple(W_shape[1:]), dtype=jnp.float32
        )
        self._H = jax.random.uniform(
            kh, (H_shape[0],) + tuple(H_shape[1:]), dtype=jnp.float32
        )

    @property
    def W_list(self):
        return [self._W[i : i + 1] for i in range(self._W.shape[0])]

    @property
    def H_list(self):
        return [self._H[i : i + 1] for i in range(self._H.shape[0])]

    @property
    def W(self):
        return self._W  # (rank, m_examples)

    @property
    def H(self):
        return self._H  # (rank, n_features)

    def forward(self, H=None, W=None, out_dtype=jnp.float32):
        if H is None:
            H = self.H
        if W is None:
            W = self.W
        return reconstruct_pallas(H, W, out_dtype=out_dtype)


if __name__ == "__main__":
    # Small, module-consistent shapes: rank=5, m_examples=8, n_features=32.
    n_components = 5
    m_examples = 8
    n_features = 32

    key = jax.random.PRNGKey(0)
    model = NMFBaseJax(
        W_shape=(n_components, m_examples),
        H_shape=(n_components, n_features),
        n_components=n_components,
        key=key,
    )

    X_hat = model.forward()
    X_hat = jax.block_until_ready(X_hat)

    ref = model.W.T @ model.H
    assert X_hat.shape == (m_examples, n_features)
    assert jnp.allclose(X_hat, ref, atol=1e-5, rtol=1e-5)

    # Check 2: multi-tile grid with masked edge blocks on both axes
    # (m=100 -> 2 M-blocks of 64, n=300 -> 3 N-blocks of 128).
    k2, k3 = jax.random.split(jax.random.PRNGKey(1))
    W2 = jax.random.uniform(k2, (n_components, 100), dtype=jnp.float32)
    H2 = jax.random.uniform(k3, (n_components, 300), dtype=jnp.float32)
    X2 = jax.block_until_ready(
        reconstruct_pallas(H2, W2, tm_max=64, tn_max=128)
    )
    ref2 = W2.T @ H2
    assert X2.shape == (100, 300)
    assert jnp.allclose(X2, ref2, atol=1e-5, rtol=1e-5)

    # Check 3: single-tile problem that triggers the megacore split
    # (m=16, n=512 would be 1 tile at defaults -> N axis split into 2 blocks).
    k4, k5 = jax.random.split(jax.random.PRNGKey(2))
    W3 = jax.random.uniform(k4, (n_components, 16), dtype=jnp.float32)
    H3 = jax.random.uniform(k5, (n_components, 512), dtype=jnp.float32)
    X3 = jax.block_until_ready(reconstruct_pallas(H3, W3))
    ref3 = W3.T @ H3
    assert X3.shape == (16, 512)
    assert jnp.allclose(X3, ref3, atol=1e-5, rtol=1e-5)

    print("KERNEL_OK")
</pallas_src>

<mosaic_0001>
module attributes {stable_mosaic.version = 11 : i64} {
  func.func @_reconstruct_kernel(%arg0: i32, %arg1: i32, %arg2: memref<8x8xf32, #tpu.memory_space<vmem>>, %arg3: memref<8x128xf32, #tpu.memory_space<vmem>>, %arg4: memref<8x128xf32, #tpu.memory_space<vmem>>) attributes {dimension_semantics = [#tpu.dimension_semantics<parallel>, #tpu.dimension_semantics<parallel>], iteration_bounds = array<i64: 1, 1>, scalar_prefetch = 0 : i64, scratch_operands = 0 : i64, tpu.core_type = #tpu.core_type<tc>, window_params = [{transform_indices = @transform_0, window_bounds = array<i64: 8, 8>}, {transform_indices = @transform_1, window_bounds = array<i64: 8, 128>}, {transform_indices = @transform_2, window_bounds = array<i64: 8, 128>}]} {
    %c0 = arith.constant 0 : index
    %c0_0 = arith.constant 0 : index
    %0 = vector.load %arg2[%c0, %c0_0] : memref<8x8xf32, #tpu.memory_space<vmem>>, vector<8x8xf32>
    %c0_1 = arith.constant 0 : index
    %c0_2 = arith.constant 0 : index
    %1 = vector.load %arg3[%c0_1, %c0_2] : memref<8x128xf32, #tpu.memory_space<vmem>>, vector<8x128xf32>
    %cst = arith.constant dense<0.000000e+00> : vector<8x128xf32>
    %2 = tpu.matmul %0, %1, %cst {dimension_numbers = #tpu.dot_dimension_numbers<[1], [0], [0], [1], [0, 0, 1, 1], [], []>} : vector<8x8xf32>, vector<8x128xf32>, vector<8x128xf32> -> vector<8x128xf32>
    %c0_3 = arith.constant 0 : index
    %c0_4 = arith.constant 0 : index
    %3 = vector.load %arg4[%c0_3, %c0_4] : memref<8x128xf32, #tpu.memory_space<vmem>>, vector<8x128xf32>
    tpu.vector_store %arg4[%c0_3, %c0_4], %2 {strides = array<i32>} : memref<8x128xf32, #tpu.memory_space<vmem>>, vector<8x128xf32>,
    return
  }
  func.func @transform_0(%arg0: i32, %arg1: i32) -> (i32, i32) {
    %c0_i32 = arith.constant 0 : i32
    %c0_i32_0 = arith.constant 0 : i32
    return %arg1, %c0_i32 : i32, i32
  }
  func.func @transform_1(%arg0: i32, %arg1: i32) -> (i32, i32) {
    %c0_i32 = arith.constant 0 : i32
    %c0_i32_0 = arith.constant 0 : i32
    return %c0_i32, %arg0 : i32, i32
  }
  func.func @transform_2(%arg0: i32, %arg1: i32) -> (i32, i32) {
    %c0_i32 = arith.constant 0 : i32
    return %arg1, %arg0 : i32, i32
  }
}

</mosaic_0001>

<bundles_post_ra>
// kernel: tpu_custom_call.1
= control target key start
LH: loop header
LB: loop body
LE: loop exit
PB: predicated region body
PF: predicated region fallthrough
CT: control target
= control target key end

     0   :  { %7 = vsyncpa [#allocation3], 0  ;;  %s270_s0 = inlined_call_operand.hbm [shape: f32[8,8], index: 0, kind: input, shape index: {}]   ;;  %s271_s1 = inlined_call_operand.hbm [shape: f32[8,32], index: 1, kind: input, shape index: {}]   ;;  %s272_s2 = inlined_call_operand.hbm [shape: f32[8,32], index: 2, kind: output, shape index: {}]  }
   0x1   :  { %8 = vsyncpa [#allocation6], 0 }
   0x2   :  { %9 = vsyncpa [#allocation4], 0  ;;  %s214_s9 = smov [#allocation2]   ;;  %s215_s11 = smov [#allocation5]  }
   0x3   :  { %s16_s10 = sshll.u32 %s214_s9, 4  ;;  %s26_s12 = sshll.u32 %s215_s11, 4  ;;  %s17_s10 = int_to_ptr.vmem [resolvable:$true] %s16_s10  ;;  %s27_s12 = int_to_ptr.vmem [resolvable:$true] %s26_s12 }
   0x4   :  { %s142_s15 = scalar_lea.hbm %s270_s0, 128 }
   0x5   :  { %p143_p0 = scmp.ne.s32.totalorder %s270_s0, %s142_s15  ;;  %p146_p1 = scmp.lt.u32.totalorder %s142_s15, %s270_s0 }
   0x7   :  { %p148_p2 = pnand %p146_p1, %p143_p0 }
   0x9   :  { %151 = shalt.err (!%p148_p2)
}
   0xa   :  { %s152_s20 = scalar_lea.vmem %s17_s10, 128  ;;  %p157_p4 = scmp.lt.s32.totalorder %s17_s10, %s17_s10 }
   0xb   :  { %p153_p3 = scmp.ne.s32.totalorder %s17_s10, %s152_s20  ;;  %p158_p5 = scmp.lt.s32.totalorder %s152_s20, %s152_s20 }
   0xd   :  { %p159_p6 = por %p158_p5, %p157_p4 }
   0xf   :  { %p160_p7 = pnand %p159_p6, %p153_p3 }
  0x11   :  { %163 = shalt.err (!%p160_p7)
}
  0x12   :  { %19 = dma.hbm_to_vmem [thread:$0]  %s270_s0, 128, %s17_s10, [#allocation3]  }
  0x13   :  { %s164_s25 = scalar_lea.hbm %s271_s1, 128 }
  0x14   :  { %p165_p8 = scmp.ne.s32.totalorder %s271_s1, %s164_s25  ;;  %p168_p9 = scmp.lt.u32.totalorder %s164_s25, %s271_s1 }
  0x16   :  { %p170_p10 = pnand %p168_p9, %p165_p8 }
  0x18   :  { %173 = shalt.err (!%p170_p10)
}
  0x19   :  { %s174_s30 = scalar_lea.vmem %s27_s12, 128  ;;  %p179_p12 = scmp.lt.s32.totalorder %s27_s12, %s27_s12 }
  0x1a   :  { %p175_p11 = scmp.ne.s32.totalorder %s27_s12, %s174_s30  ;;  %p180_p13 = scmp.lt.s32.totalorder %s174_s30, %s174_s30 }
  0x1c   :  { %p181_p0 = por %p180_p13, %p179_p12 }
  0x1e   :  { %p182_p1 = pnand %p181_p0, %p175_p11 }
  0x20   :  { %185 = shalt.err (!%p182_p1)
}
  0x21   :  { %29 = dma.hbm_to_vmem [thread:$0]  %s271_s1, 128, %s27_s12, [#allocation6]  }
  0x22   :  { %208 = dma.done.wait [#allocation3], 128  }
  0x23   :  { %209 = vsyncadd [#allocation3], 4294967168 }
  0x24   :  { %210 = dma.done.wait [#allocation6], 128  }
  0x25   :  { %211 = vsyncadd [#allocation6], 4294967168  ;;  %v216_v0 = vmov 0.0   ;;  %vm217_vm0 = vmmov 0   ;;  %vm38_vm1 = vcmask 64512   ;;  %v37_v1 = vld [vmem:[#allocation5] sm:$0xff] }
  0x26   :  { %132 = vmatprep.subr.mxu0 %v216_v0  ;;  %134 = vmatprep.mubr.msk.f32.mxu0 %vm217_vm0, %v216_v0  ;;  %v36_v2 = vld [vmem:[#allocation2] sm:$0xff]  ;;  %s218_s4 = smov [#allocation7]  }
  0x27   :  { %133 = vmatpush3.msra.mxu0 %v37_v1  ;;  %s119_s5 = sshll.u32 %s218_s4, 4  ;;  %s120_s5 = int_to_ptr.vmem [resolvable:$true] %s119_s5 }
  0x28   :  { %135 = vmatmul.mubr.msk.f32.vlgmr.msra.gmra.mrb[0].mxu0 %vm38_vm1, %v36_v2  ;;  %s186_s1 = scalar_lea.vmem %s120_s5, 128  ;;  %p191_p3 = scmp.lt.s32.totalorder %s120_s5, %s120_s5 }
  0x29   :  { %p187_p2 = scmp.ne.s32.totalorder %s120_s5, %s186_s1  ;;  %p192_p4 = scmp.lt.s32.totalorder %s186_s1, %s186_s1 }
  0x2b   :  { %p193_p5 = por %p192_p4, %p191_p3 }
  0x2d   :  { %p194_p6 = pnand %p193_p5, %p187_p2 }
  0xfb   :  { %v108_v3 = vpop.f32.mrb[0].mxu0 }
  0xfc   :  { %112 = vst [vmem:[#allocation7] sm:$0xff] %v108_v3  ;;  %v136_v4 = vpop.f32.mrb[1].mxu0 }
  0xfd   :  { %197 = shalt.err (!%p194_p6)
}
  0xfe   :  { %s198_s8 = scalar_lea.hbm %s272_s2, 128 }
  0xff   :  { %p199_p7 = scmp.ne.s32.totalorder %s272_s2, %s198_s8  ;;  %p202_p8 = scmp.lt.u32.totalorder %s198_s8, %s272_s2 }
 0x101   :  { %p204_p9 = pnand %p202_p8, %p199_p7 }
 0x103   :  { %207 = shalt.err (!%p204_p9)
}
 0x104   :  { %122 = dma.vmem_to_hbm [thread:$0]  %s120_s5, 128, %s272_s2, [#allocation4]  }
 0x105   :  { %212 = dma.done.wait [#allocation4], 128  }
 0x106   :  { %213 = vsyncadd [#allocation4], 4294967168 }
 0x107   :  { %126 = vsyncpa [#allocation3], 1 }
 0x108   :  { %127 = vsyncpa [#allocation6], 1 }
 0x109   :  { %128 = vsyncpa [#allocation4], 1 }

</bundles_post_ra>
